<compile_context>
chip_gen: v6e
topology: v6e:2x2x1
jax: 0.10.0
libtpu: 0.0.40
codegen_flags: <defaults>
</compile_context>

<pallas_src>
import jax
import jax.numpy as jnp
from jax.experimental import pallas as pl
from jax.experimental.pallas import tpu as pltpu

LANES = 128


def _round_up(n: int, m: int) -> int:
    return ((n + m - 1) // m) * m


def _cdiv(a: int, b: int) -> int:
    return -(-a // b)


def _bnn_mlp_kernel(x_ref, w1_ref, b1_ref, w2_ref, b2_ref, w3t_ref, b3_ref, o_ref):
    x = x_ref[...]                                            # (TB, 1) f32
    # Layer 1: in_features == 1 -> rank-1 broadcast multiply on the VPU (off the MXU).
    h1 = jnp.maximum(x * w1_ref[0] + b1_ref[0], 0.0)          # (TB, Hp) f32

    # Layer 2: bf16 MXU matmul with f32 accumulation; bias + ReLU stay f32 on VPU.
    h2 = jnp.dot(h1.astype(jnp.bfloat16), w2_ref[0],
                 preferred_element_type=jnp.float32) + b2_ref[0]
    h2 = jnp.maximum(h2, 0.0)                                 # (TB, Hp) f32

    # Layer 3: only out_dim (=2) real columns -> VPU multiply + XLU lane reduction
    # instead of a 126/128-lane-wasted MXU matmul. Result is already narrow (TB, 2).
    w3t = w3t_ref[0]                                          # (out_dim, Hp) f32
    tb, out_dim = o_ref.shape[1], o_ref.shape[2]
    lane = jax.lax.broadcasted_iota(jnp.int32, (tb, out_dim), 1)
    out = jnp.zeros((tb, out_dim), jnp.float32)
    for c in range(out_dim):                                  # out_dim is tiny & static
        col = jnp.sum(h2 * w3t[c:c + 1, :], axis=-1, keepdims=True)   # (TB, 1)
        out = jnp.where(lane == c, col, out)
    out = out + b3_ref[0]                                     # bias (1, out_dim)
    o_ref[0] = out.astype(o_ref.dtype)                        # narrow, contiguous store


def pack_sampled_params(per_sample_params):
    """per_sample_params: list over S weight samples of (w1, b1, w2, b2, w3, b3)
    with w_i: (in, out) and b_i: (1, out) or (out,). Pads hidden width to 128 lanes,
    casts the layer-2 weight to bf16, transposes layer-3 weights, and stacks a
    leading sample axis. Do this ONCE per weight sample (hoisted out of forward)."""
    f32 = jnp.float32
    H = per_sample_params[0][2].shape[0]                      # hidden dim (w2 in-dim)
    out_dim = per_sample_params[0][4].shape[1]
    Hp = _round_up(max(H, LANES), LANES)

    def pack_one(w1, b1, w2, b2, w3, b3):
        w1p = jnp.zeros((1, Hp), f32).at[:, :H].set(w1.astype(f32))
        b1p = jnp.zeros((1, Hp), f32).at[:, :H].set(b1.reshape(1, -1).astype(f32))
        w2p = jnp.zeros((Hp, Hp), f32).at[:H, :H].set(w2.astype(f32)).astype(jnp.bfloat16)
        b2p = jnp.zeros((1, Hp), f32).at[:, :H].set(b2.reshape(1, -1).astype(f32))
        w3t = jnp.zeros((out_dim, Hp), f32).at[:, :H].set(w3.T.astype(f32))
        b3p = b3.reshape(1, -1).astype(f32)
        return w1p, b1p, w2p, b2p, w3t, b3p

    packed = [pack_one(*p) for p in per_sample_params]
    return tuple(jnp.stack([p[i] for p in packed], axis=0) for i in range(6))


def bayesian_regressor_forward_samples(x, packed, *, block_b=1024):
    """x: (B, 1); packed: output of pack_sampled_params. Returns (S, B, out_dim)."""
    w1p, b1p, w2p, b2p, w3t, b3p = packed
    S = w1p.shape[0]
    Hp = w1p.shape[-1]
    out_dim = b3p.shape[-1]
    B = x.shape[0]
    x = x.astype(jnp.float32).reshape(B, 1)

    # Batch tiling: TB multiple of 8 (sublane). Large tiles amortize the ~0.35us
    # per-grid-step overhead; if a single sample would give a 1-step grid, halve the
    # tile so both v7x TensorCores get work (no-op on v5e/v6e beyond one extra step).
    TB = _round_up(min(block_b, B), 8)
    if S * _cdiv(B, TB) < 2 and B > 8:
        TB = _round_up(_cdiv(B, 2), 8)
    Bp = _round_up(B, TB)
    if Bp != B:
        x = jnp.zeros((Bp, 1), jnp.float32).at[:B].set(x)

    grid = (S, Bp // TB)

    def per_sample(block_shape):
        # Weights/biases: resident per sample (constant over the batch axis).
        return pl.BlockSpec(block_shape, lambda s, i: (s, 0, 0))

    out = pl.pallas_call(
        _bnn_mlp_kernel,
        out_shape=jax.ShapeDtypeStruct((S, Bp, out_dim), jnp.float32),
        grid=grid,
        in_specs=[
            # x tiled over batch rows; its (TB,1) VMEM footprint is lane-padded 128x
            # but stays ~1 MiB even at TB=1024 — acceptable, so kept simple.
            pl.BlockSpec((TB, 1), lambda s, i: (i, 0)),
            per_sample((1, 1, Hp)),          # w1
            per_sample((1, 1, Hp)),          # b1
            per_sample((1, Hp, Hp)),         # w2 (bf16)
            per_sample((1, 1, Hp)),          # b2
            per_sample((1, out_dim, Hp)),    # w3 (transposed, f32)
            per_sample((1, 1, out_dim)),     # b3
        ],
        out_specs=pl.BlockSpec((1, TB, out_dim), lambda s, i: (s, i, 0)),
        compiler_params=pltpu.CompilerParams(
            # Sample and batch axes are both embarrassingly parallel.
            dimension_semantics=("parallel", "parallel"),
            vmem_limit_bytes=32 * 1024 * 1024,
        ),
    )(x, w1p, b1p, w2p, b2p, w3t, b3p)

    return out[:, :B, :]


def bayesian_regressor_forward(x, w1, b1, w2, b2, w3, b3, *, block_b=1024):
    """Single weight sample, matching module.forward: returns (B, out_dim)."""
    packed = pack_sampled_params([(w1, b1, w2, b2, w3, b3)])
    return bayesian_regressor_forward_samples(x, packed, block_b=block_b)[0]


def sample_bnn_linear_params(key, in_features, out_features, rho_init=-3.0):
    """Deterministic 'Bayes by backprop' weight sample: w = mu + softplus(rho) * eps."""
    k_mu_w, k_eps_w, k_mu_b, k_eps_b = jax.random.split(key, 4)
    bound = 1.0 / jnp.sqrt(jnp.float32(in_features))
    mu_w = jax.random.uniform(k_mu_w, (out_features, in_features), jnp.float32, -bound, bound)
    mu_b = jax.random.uniform(k_mu_b, (out_features,), jnp.float32, -bound, bound)
    rho_w = jnp.full((out_features, in_features), rho_init, jnp.float32)
    rho_b = jnp.full((out_features,), rho_init, jnp.float32)
    eps_w = jax.random.normal(k_eps_w, (out_features, in_features), jnp.float32)
    eps_b = jax.random.normal(k_eps_b, (out_features,), jnp.float32)
    w = mu_w + jax.nn.softplus(rho_w) * eps_w          # (out, in)  PyTorch layout
    b = mu_b + jax.nn.softplus(rho_b) * eps_b          # (out,)
    # Transpose to kernel layout (in, out); bias to (1, out).
    return w.T, b[None, :]


if __name__ == "__main__":
    hidden_dim = 32   # small-shape stand-in for the default 64
    batch = 64
    samples = 2       # fused Monte-Carlo weight samples in one launch
    block_b = 16      # small tile so the demo exercises a (samples, batch-tiles) grid

    key = jax.random.PRNGKey(0)
    kx, ks = jax.random.split(key)

    # Input: regression on a scalar feature -> (batch, 1)
    x = jax.random.normal(kx, (batch, 1), jnp.float32)

    per_sample_params = []
    for sk in jax.random.split(ks, samples):
        k1, k2, k3 = jax.random.split(sk, 3)
        w1, b1 = sample_bnn_linear_params(k1, 1, hidden_dim)
        w2, b2 = sample_bnn_linear_params(k2, hidden_dim, hidden_dim)
        w3, b3 = sample_bnn_linear_params(k3, hidden_dim, 2)
        per_sample_params.append((w1, b1, w2, b2, w3, b3))

    packed = pack_sampled_params(per_sample_params)   # pad/cast/stack ONCE per sample
    out = bayesian_regressor_forward_samples(x, packed, block_b=block_b)
    out = jax.block_until_ready(out)
    assert out.shape == (samples, batch, 2)

    # Reference checks (pure JAX, unpadded parameters).
    for s, (w1, b1, w2, b2, w3, b3) in enumerate(per_sample_params):
        h1 = jnp.maximum(x * w1 + b1, 0.0)            # in_features == 1
        # bf16-matched reference (kernel runs layer 2 in bf16 with f32 accumulation).
        h2m = jnp.maximum(
            jnp.dot(h1.astype(jnp.bfloat16), w2.astype(jnp.bfloat16),
                    preferred_element_type=jnp.float32) + b2, 0.0)
        ref_matched = h2m @ w3 + b3
        assert jnp.allclose(out[s], ref_matched, atol=1e-4, rtol=1e-3)
        # Loose sanity check against the all-f32 reference.
        h2 = jnp.maximum(h1 @ w2 + b2, 0.0)
        ref_f32 = h2 @ w3 + b3
        assert jnp.allclose(out[s], ref_f32, atol=5e-2, rtol=5e-2)

    # Single-sample convenience path (matches module.forward semantics).
    w1, b1, w2, b2, w3, b3 = per_sample_params[0]
    out1 = jax.block_until_ready(
        bayesian_regressor_forward(x, w1, b1, w2, b2, w3, b3, block_b=block_b))
    assert out1.shape == (batch, 2)
    assert jnp.allclose(out1, out[0], atol=1e-6, rtol=1e-6)

    # TODO(synk): log_prior / log_posterior / energy_loss are training-time scalar
    # diagnostics (distribution log-probs over parameters), not part of the forward
    # hot path; left out of the kernel.
    # TODO(synk): the per-sample reparameterization (mu + softplus(rho)*eps) is done
    # in plain JAX in pack_sampled_params; it could be generated on-chip with
    # pltpu.prng_seed/prng_random_bits to avoid staging S weight copies through HBM.
    print("KERNEL_OK")
</pallas_src>

<mosaic_0001>
module attributes {stable_mosaic.version = 11 : i64} {
  func.func @_bnn_mlp_kernel(%arg0: i32, %arg1: i32, %arg2: memref<16x1xf32, #tpu.memory_space<vmem>>, %arg3: memref<1x1x128xf32, #tpu.memory_space<vmem>>, %arg4: memref<1x1x128xf32, #tpu.memory_space<vmem>>, %arg5: memref<1x128x128xbf16, #tpu.memory_space<vmem>>, %arg6: memref<1x1x128xf32, #tpu.memory_space<vmem>>, %arg7: memref<1x2x128xf32, #tpu.memory_space<vmem>>, %arg8: memref<1x1x2xf32, #tpu.memory_space<vmem>>, %arg9: memref<1x16x2xf32, #tpu.memory_space<vmem>>) attributes {dimension_semantics = [#tpu.dimension_semantics<parallel>, #tpu.dimension_semantics<parallel>], iteration_bounds = array<i64: 2, 4>, scalar_prefetch = 0 : i64, scratch_operands = 0 : i64, tpu.core_type = #tpu.core_type<tc>, window_params = [{transform_indices = @transform_0, window_bounds = array<i64: 16, 1>}, {transform_indices = @transform_1, window_bounds = array<i64: 1, 1, 128>}, {transform_indices = @transform_2, window_bounds = array<i64: 1, 1, 128>}, {transform_indices = @transform_3, window_bounds = array<i64: 1, 128, 128>}, {transform_indices = @transform_4, window_bounds = array<i64: 1, 1, 128>}, {transform_indices = @transform_5, window_bounds = array<i64: 1, 2, 128>}, {transform_indices = @transform_6, window_bounds = array<i64: 1, 1, 2>}, {transform_indices = @transform_7, window_bounds = array<i64: 1, 16, 2>}]} {
    %c0 = arith.constant 0 : index
    %c0_0 = arith.constant 0 : index
    %0 = vector.load %arg2[%c0, %c0_0] : memref<16x1xf32, #tpu.memory_space<vmem>>, vector<16x1xf32>
    %c0_1 = arith.constant 0 : index
    %c0_2 = arith.constant 0 : index
    %c0_3 = arith.constant 0 : index
    %1 = vector.load %arg3[%c0_1, %c0_2, %c0_3] : memref<1x1x128xf32, #tpu.memory_space<vmem>>, vector<1x1x128xf32>
    %2 = vector.shape_cast %1 : vector<1x1x128xf32> to vector<1x128xf32>
    %3 = vector.broadcast %0 : vector<16x1xf32> to vector<16x128xf32>
    %4 = vector.broadcast %2 : vector<1x128xf32> to vector<16x128xf32>
    %5 = arith.mulf %3, %4 : vector<16x128xf32>
    %c0_4 = arith.constant 0 : index
    %c0_5 = arith.constant 0 : index
    %c0_6 = arith.constant 0 : index
    %6 = vector.load %arg4[%c0_4, %c0_5, %c0_6] : memref<1x1x128xf32, #tpu.memory_space<vmem>>, vector<1x1x128xf32>
    %7 = vector.shape_cast %6 : vector<1x1x128xf32> to vector<1x128xf32>
    %8 = vector.broadcast %7 : vector<1x128xf32> to vector<16x128xf32>
    %9 = arith.addf %5, %8 : vector<16x128xf32>
    %cst = arith.constant 0.000000e+00 : f32
    %10 = vector.broadcast %cst : f32 to vector<16x128xf32>
    %11 = arith.maximumf %9, %10 : vector<16x128xf32>
    %12 = arith.truncf %11 : vector<16x128xf32> to vector<16x128xbf16>
    %c0_7 = arith.constant 0 : index
    %c0_8 = arith.constant 0 : index
    %c0_9 = arith.constant 0 : index
    %13 = vector.load %arg5[%c0_7, %c0_8, %c0_9] : memref<1x128x128xbf16, #tpu.memory_space<vmem>>, vector<1x128x128xbf16>
    %14 = vector.shape_cast %13 : vector<1x128x128xbf16> to vector<128x128xbf16>
    %cst_10 = arith.constant dense<0.000000e+00> : vector<16x128xf32>
    %15 = tpu.matmul %12, %14, %cst_10 {dimension_numbers = #tpu.dot_dimension_numbers<[1], [0], [0], [1], [0, 0, 1, 1], [], []>} : vector<16x128xbf16>, vector<128x128xbf16>, vector<16x128xf32> -> vector<16x128xf32>
    %c0_11 = arith.constant 0 : index
    %c0_12 = arith.constant 0 : index
    %c0_13 = arith.constant 0 : index
    %16 = vector.load %arg6[%c0_11, %c0_12, %c0_13] : memref<1x1x128xf32, #tpu.memory_space<vmem>>, vector<1x1x128xf32>
    %17 = vector.shape_cast %16 : vector<1x1x128xf32> to vector<1x128xf32>
    %18 = vector.broadcast %17 : vector<1x128xf32> to vector<16x128xf32>
    %19 = arith.addf %15, %18 : vector<16x128xf32>
    %cst_14 = arith.constant 0.000000e+00 : f32
    %20 = vector.broadcast %cst_14 : f32 to vector<16x128xf32>
    %21 = arith.maximumf %19, %20 : vector<16x128xf32>
    %c0_15 = arith.constant 0 : index
    %c0_16 = arith.constant 0 : index
    %c0_17 = arith.constant 0 : index
    %22 = vector.load %arg7[%c0_15, %c0_16, %c0_17] : memref<1x2x128xf32, #tpu.memory_space<vmem>>, vector<1x2x128xf32>
    %23 = vector.shape_cast %22 : vector<1x2x128xf32> to vector<2x128xf32>
    %24 = tpu.iota {dimensions = array<i32: 1>} : vector<16x2xi32>
    %cst_18 = arith.constant 0.000000e+00 : f32
    %25 = vector.broadcast %cst_18 : f32 to vector<16x2xf32>
    %26 = vector.extract_strided_slice %23 {offsets = [0, 0], sizes = [1, 128], strides = [1, 1]} : vector<2x128xf32> to vector<1x128xf32>
    %27 = vector.broadcast %26 : vector<1x128xf32> to vector<16x128xf32>
    %28 = arith.mulf %21, %27 : vector<16x128xf32>
    %cst_19 = arith.constant dense<0.000000e+00> : vector<16xf32>
    %29 = vector.multi_reduction <add>, %28, %cst_19 [1] : vector<16x128xf32> to vector<16xf32>
    %30 = vector.shape_cast %29 : vector<16xf32> to vector<16x1xf32>
    %c0_i32 = arith.constant 0 : i32
    %31 = vector.broadcast %c0_i32 : i32 to vector<16x2xi32>
    %32 = arith.cmpi eq, %24, %31 : vector<16x2xi32>
    %33 = vector.shape_cast %30 : vector<16x1xf32> to vector<16x1xf32>
    %34 = vector.broadcast %33 : vector<16x1xf32> to vector<16x2xf32>
    %35 = arith.select %32, %34, %25 : vector<16x2xi1>, vector<16x2xf32>
    %36 = vector.extract_strided_slice %23 {offsets = [1, 0], sizes = [1, 128], strides = [1, 1]} : vector<2x128xf32> to vector<1x128xf32>
    %37 = vector.broadcast %36 : vector<1x128xf32> to vector<16x128xf32>
    %38 = arith.mulf %21, %37 : vector<16x128xf32>
    %cst_20 = arith.constant dense<0.000000e+00> : vector<16xf32>
    %39 = vector.multi_reduction <add>, %38, %cst_20 [1] : vector<16x128xf32> to vector<16xf32>
    %40 = vector.shape_cast %39 : vector<16xf32> to vector<16x1xf32>
    %c1_i32 = arith.constant 1 : i32
    %41 = vector.broadcast %c1_i32 : i32 to vector<16x2xi32>
    %42 = arith.cmpi eq, %24, %41 : vector<16x2xi32>
    %43 = vector.shape_cast %40 : vector<16x1xf32> to vector<16x1xf32>
    %44 = vector.broadcast %43 : vector<16x1xf32> to vector<16x2xf32>
    %45 = arith.select %42, %44, %35 : vector<16x2xi1>, vector<16x2xf32>
    %c0_21 = arith.constant 0 : index
    %c0_22 = arith.constant 0 : index
    %c0_23 = arith.constant 0 : index
    %46 = vector.load %arg8[%c0_21, %c0_22, %c0_23] : memref<1x1x2xf32, #tpu.memory_space<vmem>>, vector<1x1x2xf32>
    %47 = vector.shape_cast %46 : vector<1x1x2xf32> to vector<1x2xf32>
    %48 = vector.broadcast %47 : vector<1x2xf32> to vector<16x2xf32>
    %49 = arith.addf %45, %48 : vector<16x2xf32>
    %c0_24 = arith.constant 0 : index
    %c0_25 = arith.constant 0 : index
    %c0_26 = arith.constant 0 : index
    %50 = vector.load %arg9[%c0_24, %c0_25, %c0_26] : memref<1x16x2xf32, #tpu.memory_space<vmem>>, vector<1x16x2xf32>
    %51 = vector.shape_cast %50 : vector<1x16x2xf32> to vector<16x2xf32>
    %52 = vector.shape_cast %49 : vector<16x2xf32> to vector<1x16x2xf32>
    tpu.vector_store %arg9[%c0_24, %c0_25, %c0_26], %52 {strides = array<i32>} : memref<1x16x2xf32, #tpu.memory_space<vmem>>, vector<1x16x2xf32>,
    return
  }
  func.func @transform_0(%arg0: i32, %arg1: i32) -> (i32, i32) {
    %c0_i32 = arith.constant 0 : i32
    %c0_i32_0 = arith.constant 0 : i32
    return %arg1, %c0_i32 : i32, i32
  }
  func.func @transform_1(%arg0: i32, %arg1: i32) -> (i32, i32, i32) {
    %c0_i32 = arith.constant 0 : i32
    %c0_i32_0 = arith.constant 0 : i32
    %c0_i32_1 = arith.constant 0 : i32
    return %arg0, %c0_i32, %c0_i32_0 : i32, i32, i32
  }
  func.func @transform_2(%arg0: i32, %arg1: i32) -> (i32, i32, i32) {
    %c0_i32 = arith.constant 0 : i32
    %c0_i32_0 = arith.constant 0 : i32
    %c0_i32_1 = arith.constant 0 : i32
    return %arg0, %c0_i32, %c0_i32_0 : i32, i32, i32
  }
  func.func @transform_3(%arg0: i32, %arg1: i32) -> (i32, i32, i32) {
    %c0_i32 = arith.constant 0 : i32
    %c0_i32_0 = arith.constant 0 : i32
    %c0_i32_1 = arith.constant 0 : i32
    return %arg0, %c0_i32, %c0_i32_0 : i32, i32, i32
  }
  func.func @transform_4(%arg0: i32, %arg1: i32) -> (i32, i32, i32) {
    %c0_i32 = arith.constant 0 : i32
    %c0_i32_0 = arith.constant 0 : i32
    %c0_i32_1 = arith.constant 0 : i32
    return %arg0, %c0_i32, %c0_i32_0 : i32, i32, i32
  }
  func.func @transform_5(%arg0: i32, %arg1: i32) -> (i32, i32, i32) {
    %c0_i32 = arith.constant 0 : i32
    %c0_i32_0 = arith.constant 0 : i32
    %c0_i32_1 = arith.constant 0 : i32
    return %arg0, %c0_i32, %c0_i32_0 : i32, i32, i32
  }
  func.func @transform_6(%arg0: i32, %arg1: i32) -> (i32, i32, i32) {
    %c0_i32 = arith.constant 0 : i32
    %c0_i32_0 = arith.constant 0 : i32
    %c0_i32_1 = arith.constant 0 : i32
    return %arg0, %c0_i32, %c0_i32_0 : i32, i32, i32
  }
  func.func @transform_7(%arg0: i32, %arg1: i32) -> (i32, i32, i32) {
    %c0_i32 = arith.constant 0 : i32
    %c0_i32_0 = arith.constant 0 : i32
    return %arg0, %arg1, %c0_i32 : i32, i32, i32
  }
}

</mosaic_0001>

<bundles_post_ra>
// kernel: tpu_custom_call.1
= control target key start
LH: loop header
LB: loop body
LE: loop exit
PB: predicated region body
PF: predicated region fallthrough
CT: control target
= control target key end

     0   :  { %12 = vsyncpa [#allocation3], 0  ;;  %s1204_s0 = inlined_call_operand.vmem [shape: f32[64,1], index: 0, kind: input, shape index: {}]   ;;  %s1205_s1 = inlined_call_operand.vmem [shape: f32[2,1,128], index: 1, kind: input, shape index: {}]   ;;  %s1206_s2 = inlined_call_operand.vmem [shape: f32[2,1,128], index: 2, kind: input, shape index: {}]   ;;  %s1207_s3 = inlined_call_operand.hbm [shape: bf16[2,128,128], index: 3, kind: input, shape index: {}]   ;;  %s1208_s4 = inlined_call_operand.vmem [shape: f32[2,1,128], index: 4, kind: input, shape index: {}]   ;;  %s1209_s5 = inlined_call_operand.vmem [shape: f32[2,2,128], index: 5, kind: input, shape index: {}]   ;;  %s1210_s6 = inlined_call_operand.vmem [shape: f32[2,1,2], index: 6, kind: input, shape index: {}]   ;;  %s1211_s7 = inlined_call_operand.vmem [shape: f32[2,64,2], index: 7, kind: output, shape index: {}]  }
   0x1   :  { %14 = vsyncpa [#allocation3 + $0x1], 0  ;;  %s1047_s24 = smov 0   ;;  %s1049_s25 = smov 0  }
   0x2   :  { %s1051_s26 = smov 0   ;;  %s1053_s27 = smov 0  }
   0x3   :  { %s1055_s28 = smov 0   ;;  %s1057_s29 = smov 0  }
   0x4   :  { %s1059_s30 = smov 0   ;;  %s1061_s8 = smov 0  }
   0x5 LB: > { %s761_s9 = sadd.s32 4294967295, %s999_s8   ;;  %s29_s10 = sadd.s32 1, %s991_s29  ;;  %s999_s8 = sphi %s1061_s8, %s20_s8   ;;  %s995_s30 = sphi %s1059_s30, %s1226_s30   ;;  %s991_s29 = sphi %s1057_s29, %s1225_s29   ;;  %s987_s28 = sphi %s1055_s28, %s1224_s28   ;;  %s983_s27 = sphi %s1053_s27, %s1223_s27   ;;  %s979_s26 = sphi %s1051_s26, %s1222_s26   ;;  %s975_s25 = sphi %s1049_s25, %s1221_s25   ;;  %s971_s24 = sphi %s1047_s24, %s1220_s24  }
   0x6   : > { %p30_p0 = scmp.ge.s32.totalorder %s29_s10, 4  ;;  %s32_s11 = sadd.s32 1, %s995_s30 }
   0x7   : > { %s117_s12 = sadd.s32 1, %s979_s26  ;;  %p124_p1 = scmp.ne.s32.totalorder %s979_s26, %s975_s25 }
   0x8   : > { %s1228_s10 = smov (%p30_p0, %s29_s10), 0  ;;  %s1230_s11 = smov (!%p30_p0, %s32_s11), %s995_s30 }
   0x9   : > { %1213 = sst [smem:[#allocation5_spill]] %s1228_s10  ;;  %p125_p2 = scmp.eq.s32.totalorder %s999_s8, 0 }
   0xa   : > { %p130_p3 = scmp.ne.s32.totalorder %s975_s25, %s971_s24  ;;  %p34_p4 = scmp.ge.s32.totalorder %s1230_s11, 2 }
   0xb   : > { %p131_p5 = scmp.eq.s32.totalorder %s761_s9, 0  ;;  %p1096_p6 = por %p125_p2, %p124_p1 }
   0xc   : > { %s1232_s11 = smov (%p34_p4, %s1230_s11), 0  ;;  %p826_p8 = scmp.lt.s32.totalorder %s999_s8, 8 }
   0xd   : > { %1215 = sst [smem:[#allocation6_spill]] %s1232_s11  ;;  %p1102_p7 = por %p131_p5, %p130_p3 }
   0xe   : > { %s114_s15 = ssub.s32 %s995_s30, %s1232_s11  ;;  %s281_s16 = sand.u32 1, %s979_s26  }
   0xf   : > { %p115_p9 = scmp.eq.s32.totalorder %s114_s15, 0  ;;  %s765_s17 = sshll.u32 %s281_s16, 6 }
  0x10   : > { %s790_s18 = sshll.u32 %s995_s30, 10  ;;  %s285_s23 = scalar_lea.vmem [#allocation2], %s765_s17 }
  0x11   : > { %s1112_s19 = scalar_select %p115_p9, %s979_s26, %s117_s12  }
  0x12   : > { %s291_s22 = scalar_lea.hbm %s1207_s3, %s790_s18  ;;  %s292_s24 = sshll.u32 %s285_s23, 4  ;;  %s293_s24 = int_to_ptr.vmem [resolvable:$true] %s292_s24 }
  0x13   : > { %p1119_p10 = pnand %p826_p8, %p1096_p6  ;;  %s282_s11 = scalar_lea.sflag [#allocation3], %s281_s16 }
  0x14   : > { %s918_s15 = scalar_lea.vmem %s293_s24, 1024  ;;  %s1001_s12 = smov [#allocation2]  }
  0x15   : > { %p907_p11 = pneg %p1119_p10  ;;  %p919_p12 = scmp.ne.s32.totalorder %s293_s24, %s918_s15 }
  0x16   : > { %s923_s10 = sshll.u32 %s1001_s12, 4  ;;  %s924_s10 = int_to_ptr.vmem [resolvable:$false] %s923_s10 }
  0x17   : > { %p921_p13 = pnand %p919_p12, %p907_p11  ;;  %s925_s18 = scalar_lea.vmem %s924_s10, 2048 }
  0x18   : > { %p926_p1 = scmp.lt.s32.totalorder %s293_s24, %s924_s10  ;;  %p927_p2 = scmp.lt.s32.totalorder %s925_s18, %s918_s15 }
  0x19   : > { %p922_p0 = pneg %p921_p13 }
  0x1a   : > { %p928_p3 = por %p927_p2, %p926_p1 }
  0x1c   : > { %p929_p4 = pnand %p928_p3, %p922_p0 }
  0x1e   : > { %932 = shalt.err (!%p929_p4)
}
  0x1f   : > { %s1002_s13 = smov 64   ;;  %s1003_s16 = smov 4  }
  0x20   : > { %825 = dma.hbm_to_vmem [thread:$0]  (!%p1119_p10), %s291_s22, 1024, %s293_s24, %s282_s11, %s1002_s13, %s1002_s13, %s1003_s16  }
  0x21   : > { %p768_p5 = scmp.ge.s32.totalorder %s999_s8, 1  ;;  %p319_p6 = scmp.lt.s32.totalorder %s999_s8, 9 }
  0x23   : > { %p320_p8 = pnand %p768_p5, %p319_p6 }
  0x24   : > { %s325_s17 = sand.u32 (!%p320_p8), 1, %s975_s25  }
  0x25   : > { %323 = sbr.rel (%p320_p8) target bundleno = 535 (0x217), region = 48  ;;  %s769_s20 = sshll.u32 (!%p320_p8), %s325_s17, 6 }
  0x26   : > { %s326_s10 = scalar_lea.sflag (!%p320_p8), [#allocation3], %s325_s17  ;;  %s1130_s21 = scalar_lea.vmem (!%p320_p8), [#allocation2], %s769_s20 }
  0x2a   : > { %966 = dma.done.wait (%p1102_p7), %s326_s10, 1024  }
  0x2b   : > { %968 = vsyncadd (%p1102_p7), %s326_s10, 4294966272  ;;  %s770_s11 = sshll.u32 %s983_s27, 1  ;;  %v1004_v0 = vmov 0   ;;  %v1005_v1 = vmov 0.0   ;;  %v897_v3 = vld [vmem:[%s1130_s21 + $0x38] sm:$0xff]   ;;  %v898_v5 = vld [vmem:[%s1130_s21 + $0x30] sm:$0xff]   ;;  %v566_v23 = vlaneseq }
  0x2c   : > { %896 = vset.pattern.permute.xlu0 %v1004_v0  ;;  %p386_p9 = scmp.lt.s32.totalorder %s770_s11, 7  ;;  %800 = vmatprep.subr.bf16.mxu0 %v1005_v1  ;;  %vm1006_vm0 = vmmov 0   ;;  %v899_v6 = vld [vmem:[%s1130_s21 + $0x28] sm:$0xff]   ;;  %v900_v7 = vld [vmem:[%s1130_s21 + $0x20] sm:$0xff]   ;;  %v901_v8 = vld [vmem:[%s1130_s21 + $0x18] sm:$0xff]   ;;  %p391_p7 = scmp.lt.s32.totalorder %s987_s28, 1 }
  0x2d   : > { %801 = vmatpush3.bf16.msra.mxu0 %v897_v3  ;;  %816 = vmatprep.mubr.msk.bf16.mxu0 %vm1006_vm0, %v1005_v1  ;;  %v902_v9 = vld [vmem:[%s1130_s21 + $0x10] sm:$0xff]   ;;  %v903_v10 = vld [vmem:[%s1130_s21 + $0x8] sm:$0xff]   ;;  %v904_v11 = vld [vmem:[%s1130_s21] sm:$0xff]   ;;  %v569_v24 = vshrl.u32 %v566_v23, 7  ;;  %v567_v43 = vand.u32 127, %v566_v23  ;;  %vm603_vm3 = vcmask 15360  }
  0x2e   : > { %s1234_s11 = smov (!%p386_p9, %s770_s11), 7  ;;  %802 = vmatprep.subr.bf16.mxu0 %v1005_v1  ;;  %s1236_s28 = smov (!%p391_p7, %s987_s28), 1 }
  0x2f   : > { %s771_s22 = sshll.u32 %s1234_s11, 3  ;;  %s393_s15 = scalar_lea.vmem %s1205_s1, %s1236_s28  ;;  %v583_v25 = vsub.s32 1, %v569_v24  ;;  %v570_v26 = vsub.s32 0, %v569_v24  ;;  %vm578_vm1 = vcmp.eq.s32.totalorder %v567_v43, 0  ;;  %vm591_vm2 = vcmp.eq.s32.totalorder %v567_v43, 1 }
  0x30   : > { %s389_s14 = scalar_lea.vmem %s1204_s0, %s771_s22  ;;  %v776_v12 = vld [vmem:[%s393_s15] ss:$0 sm:$0xff]  ;;  %s396_s13 = scalar_lea.vmem %s1206_s2, %s1236_s28 }
  0x31   : > { %v418_v2 = vld [vmem:[%s389_s14] sm:$0xff]  ;;  %v419_v4 = vld [vmem:[%s389_s14 + $0x8] sm:$0xff]  ;;  %803 = vmatpush3.bf16.msra.mxu0 %v898_v5  ;;  %s772_s16 = sshll.u32 %s1236_s28, 1  ;;  %s399_s10 = scalar_lea.vmem %s1208_s4, %s1236_s28 }
  0x32   : > { %423 = vperm.xlu0 %896, %v418_v2   ;;  %804 = vmatprep.subr.bf16.mxu0 %v1005_v1  ;;  %v777_v15 = vld [vmem:[%s396_s13] ss:$0 sm:$0xff]  ;;  %s403_s23 = scalar_lea.vmem %s1209_s5, %s772_s16  ;;  %s774_s24 = sshll.u32 %s1236_s28, 3 }
  0x33   : > { %v778_v27 = vld [vmem:[%s399_s10] ss:$0 sm:$0xff]  ;;  %s413_s14 = sadd.s32 %s774_s24, %s1234_s11  ;;  %s406_s15 = scalar_lea.vmem %s1210_s6, %s1236_s28 }
  0x34   : > { %v565_v28 = vld [vmem:[%s403_s23] sm:$0x3]  ;;  %s775_s12 = sshll.u32 %s413_s14, 3 }
  0x35   : > { %805 = vmatpush3.bf16.msra.mxu0 %v899_v6  ;;  %v584_v31 = vrot.slane %v565_v28, %v583_v25  ;;  %v571_v32 = vrot.slane %v565_v28, %v570_v26  ;;  %v787_v45 = vld [vmem:[%s406_s15] ss:$0 sm:$0xff]  ;;  %s415_s16 = scalar_lea.vmem %s1211_s7, %s775_s12 }
  0x36   : > { %428 = vperm.xlu0 %896, %v419_v4   ;;  %806 = vmatprep.subr.bf16.mxu0 %v1005_v1 }
  0x39   : > { %807 = vmatpush3.bf16.msra.mxu0 %v900_v7 }
  0x3a   : > { %808 = vmatprep.subr.bf16.mxu0 %v1005_v1 }
  0x3d   : > { %809 = vmatpush3.bf16.msra.mxu0 %v901_v8 }
  0x3e   : > { %810 = vmatprep.subr.bf16.mxu0 %v1005_v1 }
  0x41   : > { %811 = vmatpush3.bf16.msra.mxu0 %v902_v9 }
  0x42   : > { %812 = vmatprep.subr.bf16.mxu0 %v1005_v1 }
  0x45   : > { %813 = vmatpush3.bf16.msra.mxu0 %v903_v10 }
  0x46   : > { %814 = vmatprep.subr.bf16.mxu0 %v1005_v1 }
  0x49   : > { %815 = vmatpush3.bf16.msra.mxu0 %v904_v11 }
  0xad   : > { %v424_v13 = vpop.permute.xlu0 %423 }
  0xae   : > { %v437_v14 = vmul.f32 %v776_v12, %v424_v13 }
  0xb0   : > { %v446_v17 = vadd.f32 %v777_v15, %v437_v14 }
  0xb1   : > { %v429_v16 = vpop.permute.xlu0 %428 }
  0xb2   : > { %v438_v18 = vmul.f32 %v776_v12, %v429_v16  ;;  %v448_v20 = vmax.f32 %v446_v17, 0.0 }
  0xb4   : > { %v447_v19 = vadd.f32 %v777_v15, %v438_v18 }
  0xb6   : > { %v449_v21 = vmax.f32 %v447_v19, 0.0 }
  0xb8   : > { %v450_v22 = vpack.c.bf16 %v449_v21, %v448_v20 }
  0xba   : > { %817 = vmatmul.mubr.bf16.vlgmr.msra.gmra.mxu0 %v450_v22 }
 0x17a   : > { %v556_v29 = vpop.f32.mrf.mxu0 }
 0x17b   : > { %v557_v30 = vadd.f32 %v778_v27, %v556_v29 }
 0x17c   : > { %v818_v33 = vpop.f32.mrf.mxu0 }
 0x17d   : > { %v563_v34 = vmax.f32 %v557_v30, 0.0 }
 0x17e   : > { %v559_v35 = vpop.f32.mrf.mxu0 }
 0x17f   : > { %v560_v36 = vadd.f32 %v778_v27, %v559_v35  ;;  %v585_v37 = vmul.f32 %v584_v31, %v563_v34  ;;  %v572_v38 = vmul.f32 %v571_v32, %v563_v34 }
 0x180   : > { %v819_v39 = vpop.f32.mrf.mxu0 }
 0x181   : > { %v564_v40 = vmax.f32 %v560_v36, 0.0  ;;  %587 = vadd.xlane.f32.xlu0 %v585_v37  ;;  %574 = vadd.xlane.f32.xlu1 %v572_v38 }
 0x183   : > { %v573_v41 = vmul.f32 %v571_v32, %v564_v40  ;;  %v586_v42 = vmul.f32 %v584_v31, %v564_v40 }
 0x185   : > { %576 = vadd.xlane.f32.xlu1 %v573_v41 }
 0x189   : > { %589 = vadd.xlane.f32.xlu1 %v586_v42 }
 0x20a   : > { %v588_v44 = vpop.xlane.xlu0 %587  ;;  %v575_v46 = vpop.xlane.xlu1 %574 }
 0x20b   : > { %v579_v47 = vsel %vm578_vm1, %v575_v46, 0.0 }
 0x20c   : > { %v592_v48 = vsel %vm591_vm2, %v588_v44, %v579_v47 }
 0x20d   : > { %v601_v49 = vadd.f32 %v787_v45, %v592_v48 }
 0x20e   : > { %v577_v50 = vpop.xlane.xlu1 %576 }
 0x20f   : > { %604 = vst.msk [vmem:[%s415_s16] sm:$0xff] %vm603_vm3, %v601_v49  ;;  %v580_v51 = vsel %vm578_vm1, %v577_v50, 0.0 }
 0x212   : > { %v590_v52 = vpop.xlane.xlu1 %589 }
 0x213   : > { %v593_v53 = vsel %vm591_vm2, %v590_v52, %v580_v51 }
 0x214   : > { %v602_v54 = vadd.f32 %v787_v45, %v593_v53 }
 0x216   : > { %605 = vst.msk [vmem:[%s415_s16 + $0x8] sm:$0xff] %vm603_vm3, %v602_v54 }
 0x217 PF: > { %s20_s8 = sadd.s32 1, %s999_s8   ;;  %s1218_s11 = sld [smem:[#allocation5_spill]] }
 0x218   : > { %p17_p10 = scmp.ge.s32.totalorder %s20_s8, 10   ;;  %s1219_s17 = sld [smem:[#allocation6_spill]] }
 0x219   : > { %s1220_s24 = smov %s975_s25  ;;  %s1221_s25 = smov %s979_s26 }
 0x21a   : > { %s1222_s26 = smov %s1112_s19  ;;  %s1223_s27 = smov %s991_s29 }
 0x21b   : > { %s1224_s28 = smov %s995_s30  ;;  %19 = sbr.rel (!%p17_p10) target bundleno = 5 (0x5), region = 106 }
 0x21d   : > { %s1225_s29 = smov %s1218_s11 }
 0x21e   : > { %s1226_s30 = smov %s1219_s17 }
 0x220   :  { %636 = vsyncpa [#allocation3], 1 }
 0x221   :  { %638 = vsyncpa [#allocation3 + $0x1], 1 }

</bundles_post_ra>
